<compile_context>
chip_gen: v6e
topology: v6e:2x2x1
jax: 0.10.0
libtpu: 0.0.40
codegen_flags: <defaults>
</compile_context>

<pallas_src>
from functools import partial

import jax
import jax.numpy as jnp
import numpy as np
from jax import lax
from jax.experimental import pallas as pl
from jax.experimental.pallas import tpu as pltpu

L_IN = 64
K1, C1 = 10, 5
K2, C2 = 5, 5
L1 = L_IN - K1 + 1          # 55
L2 = L1 - K2 + 1            # 51
H = 32

# Padded / augmented feature sizes (lane-aligned).
L_PAD = 128                 # x lanes: 64 data + 1 ones + 63 zero pad
ONES_X = L_IN               # index of the constant-1 column in x_aug
F1 = C1 * L1                # 275 conv1 features
ONES_1 = F1                 # ones passthrough column in y1
F1_PAD = 384                # 276 -> 384
F2 = C2 * L2                # 255 conv2 features
ONES_2 = F2                 # ones passthrough column in y2
F2_PAD = 256                # 256 exactly
H_PAD = 128                 # fc output padded to a full lane row

B_TILE_MAX = 512            # safe for v5e's 16 MiB scoped VMEM default; raise on v6e if desired


def _round_up(n, m):
    return ((n + m - 1) // m) * m


def vectornet_kernel(alphas_ref, x_ref, w1_ref, w2_ref, wf_ref, out_ref):
    # alphas_ref: (3,) f32 in SMEM  (PReLU a1, a2, a3 scalars)
    a1 = alphas_ref[0]
    a2 = alphas_ref[1]
    a3 = alphas_ref[2]

    # conv1 as Toeplitz matmul (bias folded; col ONES_1 carries the constant 1 forward).
    y1 = jnp.dot(x_ref[...], w1_ref[...], preferred_element_type=jnp.float32)   # (Bt, 384)
    y1 = jnp.where(y1 >= 0, y1, a1 * y1)          # PReLU(1)=1, PReLU(0)=0 -> pads survive

    # conv2 as Toeplitz matmul (bias folded; col ONES_2 carries the constant 1 forward).
    y2 = jnp.dot(y1, w2_ref[...], preferred_element_type=jnp.float32)           # (Bt, 256)
    y2 = jnp.where(y2 >= 0, y2, a2 * y2)

    # fc1 as one MXU contraction over K=256 (bias folded via the ones column).
    y3 = jnp.dot(y2, wf_ref[...], preferred_element_type=jnp.float32)           # (Bt, 128)
    out_ref[...] = jnp.where(y3 >= 0, y3, a3 * y3)                              # lane-dense store


def pack_params(p):
    """Host-side prep: fold conv/fc weights + biases into padded Toeplitz matrices."""
    w1 = np.asarray(p["w1"], np.float32)                 # (C1, K1)
    b1 = np.asarray(p["b1"], np.float32).reshape(C1)
    w2 = np.asarray(p["w2"], np.float32)                 # (C2, C1, K2)
    b2 = np.asarray(p["b2"], np.float32).reshape(C2)
    wf = np.asarray(p["wf"], np.float32)                 # (C2*L2, H)  (in, out)
    bf = np.asarray(p["bf"], np.float32).reshape(H)

    W1 = np.zeros((L_PAD, F1_PAD), np.float32)
    t = np.arange(L1)
    for c in range(C1):
        cols = c * L1 + t
        for k in range(K1):
            W1[t + k, cols] = w1[c, k]
        W1[ONES_X, cols] = b1[c]                         # conv1 bias via ones lane of x
    W1[ONES_X, ONES_1] = 1.0                             # forward the ones lane

    W2 = np.zeros((F1_PAD, F2_PAD), np.float32)
    t = np.arange(L2)
    for c2 in range(C2):
        cols = c2 * L2 + t
        for c1 in range(C1):
            for k in range(K2):
                W2[c1 * L1 + t + k, cols] = w2[c2, c1, k]
        W2[ONES_1, cols] = b2[c2]                        # conv2 bias via ones lane of y1
    W2[ONES_1, ONES_2] = 1.0                             # forward the ones lane

    WF = np.zeros((F2_PAD, H_PAD), np.float32)
    WF[:F2, :H] = wf
    WF[ONES_2, :H] = bf                                  # fc bias via ones lane of y2

    alphas = np.array([np.asarray(p["a1"]).reshape(()),
                       np.asarray(p["a2"]).reshape(()),
                       np.asarray(p["a3"]).reshape(())], np.float32)

    return dict(W1=jnp.asarray(W1), W2=jnp.asarray(W2), WF=jnp.asarray(WF),
                alphas=jnp.asarray(alphas))


@partial(jax.jit, static_argnames=("b_tile",))
def vectornet_forward(x, packed, b_tile=B_TILE_MAX):
    """x: (B, 1, L_IN) float32 -> (B, H) float32."""
    B = x.shape[0]
    x2d = jnp.asarray(x, jnp.float32).reshape(B, L_IN)

    bt = min(b_tile, max(8, _round_up(B, 8)))            # batch tile, multiple of 8
    B_pad = _round_up(B, bt)

    # Augment: cols [0,64) = x, col 64 = 1 (bias lane), cols [65,128) = 0.
    x_aug = jnp.zeros((B_pad, L_PAD), jnp.float32)
    x_aug = x_aug.at[:B, :L_IN].set(x2d)
    x_aug = x_aug.at[:, ONES_X].set(1.0)

    grid = (B_pad // bt,)
    grid_spec = pltpu.PrefetchScalarGridSpec(
        num_scalar_prefetch=0,
        grid=grid,
        in_specs=[
            pl.BlockSpec(memory_space=pltpu.MemorySpace.SMEM),    # alphas (3,) scalars
            pl.BlockSpec((bt, L_PAD), lambda i: (i, 0)),          # x tile (pipelined)
            pl.BlockSpec((L_PAD, F1_PAD), lambda i: (0, 0)),      # W1 resident
            pl.BlockSpec((F1_PAD, F2_PAD), lambda i: (0, 0)),     # W2 resident
            pl.BlockSpec((F2_PAD, H_PAD), lambda i: (0, 0)),      # WF resident
        ],
        out_specs=pl.BlockSpec((bt, H_PAD), lambda i: (i, 0)),    # lane-dense store
    )

    out = pl.pallas_call(
        vectornet_kernel,
        out_shape=jax.ShapeDtypeStruct((B_pad, H_PAD), jnp.float32),
        grid_spec=grid_spec,
        compiler_params=pltpu.CompilerParams(
            dimension_semantics=("parallel",)),                   # megacore sharding on v7x
    )(packed["alphas"], x_aug, packed["W1"], packed["W2"], packed["WF"])

    return out[:B, :H]


def init_params(key):
    ks = jax.random.split(key, 6)
    w1 = jax.random.uniform(ks[0], (C1, K1), jnp.float32, -0.3, 0.3)
    b1 = jax.random.uniform(ks[1], (1, C1), jnp.float32, -0.3, 0.3)
    w2 = jax.random.uniform(ks[2], (C2, C1, K2), jnp.float32, -0.2, 0.2)
    b2 = jax.random.uniform(ks[3], (1, C2), jnp.float32, -0.2, 0.2)
    wf = jax.random.uniform(ks[4], (C2 * L2, H), jnp.float32, -0.06, 0.06)
    bf = jax.random.uniform(ks[5], (1, H), jnp.float32, -0.06, 0.06)
    alpha = jnp.full((1, 1), 0.25, jnp.float32)   # PReLU default init (num_parameters=1)
    return dict(w1=w1, b1=b1, a1=alpha, w2=w2, b2=b2, a2=alpha,
                wf=wf, bf=bf, a3=alpha)


def reference(x, p):
    """Pure-JAX reference mirroring the PyTorch forward."""
    y = lax.conv_general_dilated(x, p["w1"].reshape(C1, 1, K1), (1,), 'VALID',
                                 dimension_numbers=('NCH', 'OIH', 'NCH'))
    y = y + p["b1"].reshape(1, C1, 1)
    y = jnp.where(y >= 0, y, 0.25 * y)
    y = lax.conv_general_dilated(y, p["w2"], (1,), 'VALID',
                                 dimension_numbers=('NCH', 'OIH', 'NCH'))
    y = y + p["b2"].reshape(1, C2, 1)
    y = jnp.where(y >= 0, y, 0.25 * y)
    y = y.reshape(x.shape[0], -1)          # channel-major flatten, like x.view(B, -1)
    y = y @ p["wf"] + p["bf"]
    return jnp.where(y >= 0, y, 0.25 * y)


if __name__ == "__main__":
    key = jax.random.PRNGKey(0)
    kx, kp = jax.random.split(key)
    B = 4
    x = jax.random.normal(kx, (B, 1, L_IN), jnp.float32)
    params = init_params(kp)
    packed = pack_params(params)

    out = vectornet_forward(x, packed)
    jax.block_until_ready(out)

    ref = reference(x, params)
    np.testing.assert_allclose(np.asarray(out), np.asarray(ref), rtol=1e-4, atol=1e-4)
    print("KERNEL_OK")
</pallas_src>

<mosaic_0001>
module attributes {stable_mosaic.version = 11 : i64} {
  func.func @vectornet_kernel(%arg0: i32, %arg1: memref<3xf32, #tpu.memory_space<smem>>, %arg2: memref<8x128xf32, #tpu.memory_space<vmem>>, %arg3: memref<128x384xf32, #tpu.memory_space<vmem>>, %arg4: memref<384x256xf32, #tpu.memory_space<vmem>>, %arg5: memref<256x128xf32, #tpu.memory_space<vmem>>, %arg6: memref<8x128xf32, #tpu.memory_space<vmem>>) attributes {dimension_semantics = [#tpu.dimension_semantics<parallel>], iteration_bounds = array<i64: 1>, scalar_prefetch = 0 : i64, scratch_operands = 0 : i64, tpu.core_type = #tpu.core_type<tc>, window_params = [{transform_indices = @transform_0, window_bounds = array<i64: 3>}, {transform_indices = @transform_1, window_bounds = array<i64: 8, 128>}, {pipeline_mode = #tpu.pipeline_mode<synchronous>, transform_indices = @transform_2, window_bounds = array<i64: 128, 384>}, {pipeline_mode = #tpu.pipeline_mode<synchronous>, transform_indices = @transform_3, window_bounds = array<i64: 384, 256>}, {pipeline_mode = #tpu.pipeline_mode<synchronous>, transform_indices = @transform_4, window_bounds = array<i64: 256, 128>}, {transform_indices = @transform_5, window_bounds = array<i64: 8, 128>}]} {
    %c0 = arith.constant 0 : index
    %0 = memref.load %arg1[%c0] : memref<3xf32, #tpu.memory_space<smem>>
    %c1 = arith.constant 1 : index
    %1 = memref.load %arg1[%c1] : memref<3xf32, #tpu.memory_space<smem>>
    %c2 = arith.constant 2 : index
    %2 = memref.load %arg1[%c2] : memref<3xf32, #tpu.memory_space<smem>>
    %c0_0 = arith.constant 0 : index
    %c0_1 = arith.constant 0 : index
    %3 = vector.load %arg2[%c0_0, %c0_1] : memref<8x128xf32, #tpu.memory_space<vmem>>, vector<8x128xf32>
    %c0_2 = arith.constant 0 : index
    %c0_3 = arith.constant 0 : index
    %4 = vector.load %arg3[%c0_2, %c0_3] : memref<128x384xf32, #tpu.memory_space<vmem>>, vector<128x384xf32>
    %cst = arith.constant dense<0.000000e+00> : vector<8x384xf32>
    %5 = tpu.matmul %3, %4, %cst {dimension_numbers = #tpu.dot_dimension_numbers<[1], [0], [0], [1], [0, 0, 1, 1], [], []>} : vector<8x128xf32>, vector<128x384xf32>, vector<8x384xf32> -> vector<8x384xf32>
    %cst_4 = arith.constant 0.000000e+00 : f32
    %6 = vector.broadcast %cst_4 : f32 to vector<8x384xf32>
    %7 = arith.cmpf oge, %5, %6 : vector<8x384xf32>
    %8 = vector.broadcast %0 : f32 to vector<8x384xf32>
    %9 = arith.mulf %8, %5 : vector<8x384xf32>
    %10 = arith.select %7, %5, %9 : vector<8x384xi1>, vector<8x384xf32>
    %c0_5 = arith.constant 0 : index
    %c0_6 = arith.constant 0 : index
    %11 = vector.load %arg4[%c0_5, %c0_6] : memref<384x256xf32, #tpu.memory_space<vmem>>, vector<384x256xf32>
    %cst_7 = arith.constant dense<0.000000e+00> : vector<8x256xf32>
    %12 = tpu.matmul %10, %11, %cst_7 {dimension_numbers = #tpu.dot_dimension_numbers<[1], [0], [0], [1], [0, 0, 1, 1], [], []>} : vector<8x384xf32>, vector<384x256xf32>, vector<8x256xf32> -> vector<8x256xf32>
    %cst_8 = arith.constant 0.000000e+00 : f32
    %13 = vector.broadcast %cst_8 : f32 to vector<8x256xf32>
    %14 = arith.cmpf oge, %12, %13 : vector<8x256xf32>
    %15 = vector.broadcast %1 : f32 to vector<8x256xf32>
    %16 = arith.mulf %15, %12 : vector<8x256xf32>
    %17 = arith.select %14, %12, %16 : vector<8x256xi1>, vector<8x256xf32>
    %c0_9 = arith.constant 0 : index
    %c0_10 = arith.constant 0 : index
    %18 = vector.load %arg5[%c0_9, %c0_10] : memref<256x128xf32, #tpu.memory_space<vmem>>, vector<256x128xf32>
    %cst_11 = arith.constant dense<0.000000e+00> : vector<8x128xf32>
    %19 = tpu.matmul %17, %18, %cst_11 {dimension_numbers = #tpu.dot_dimension_numbers<[1], [0], [0], [1], [0, 0, 1, 1], [], []>} : vector<8x256xf32>, vector<256x128xf32>, vector<8x128xf32> -> vector<8x128xf32>
    %cst_12 = arith.constant 0.000000e+00 : f32
    %20 = vector.broadcast %cst_12 : f32 to vector<8x128xf32>
    %21 = arith.cmpf oge, %19, %20 : vector<8x128xf32>
    %22 = vector.broadcast %2 : f32 to vector<8x128xf32>
    %23 = arith.mulf %22, %19 : vector<8x128xf32>
    %24 = arith.select %21, %19, %23 : vector<8x128xi1>, vector<8x128xf32>
    %c0_13 = arith.constant 0 : index
    %c0_14 = arith.constant 0 : index
    %25 = vector.load %arg6[%c0_13, %c0_14] : memref<8x128xf32, #tpu.memory_space<vmem>>, vector<8x128xf32>
    tpu.vector_store %arg6[%c0_13, %c0_14], %24 {strides = array<i32>} : memref<8x128xf32, #tpu.memory_space<vmem>>, vector<8x128xf32>,
    return
  }
  func.func @transform_0(%arg0: i32) -> i32 {
    %c0_i32 = arith.constant 0 : i32
    %c0_i32_0 = arith.constant 0 : i32
    return %c0_i32 : i32
  }
  func.func @transform_1(%arg0: i32) -> (i32, i32) {
    %c0_i32 = arith.constant 0 : i32
    %c0_i32_0 = arith.constant 0 : i32
    return %arg0, %c0_i32 : i32, i32
  }
  func.func @transform_2(%arg0: i32) -> (i32, i32) {
    %c0_i32 = arith.constant 0 : i32
    %c0_i32_0 = arith.constant 0 : i32
    %c0_i32_1 = arith.constant 0 : i32
    return %c0_i32, %c0_i32_0 : i32, i32
  }
  func.func @transform_3(%arg0: i32) -> (i32, i32) {
    %c0_i32 = arith.constant 0 : i32
    %c0_i32_0 = arith.constant 0 : i32
    %c0_i32_1 = arith.constant 0 : i32
    return %c0_i32, %c0_i32_0 : i32, i32
  }
  func.func @transform_4(%arg0: i32) -> (i32, i32) {
    %c0_i32 = arith.constant 0 : i32
    %c0_i32_0 = arith.constant 0 : i32
    %c0_i32_1 = arith.constant 0 : i32
    return %c0_i32, %c0_i32_0 : i32, i32
  }
  func.func @transform_5(%arg0: i32) -> (i32, i32) {
    %c0_i32 = arith.constant 0 : i32
    %c0_i32_0 = arith.constant 0 : i32
    return %arg0, %c0_i32 : i32, i32
  }
}

</mosaic_0001>

<bundles_post_ra>
// kernel: vectornet_forward.1
= control target key start
LH: loop header
LB: loop body
LE: loop exit
PB: predicated region body
PF: predicated region fallthrough
CT: control target
= control target key end

     0   :  { %10 = vsyncpa [#allocation4], 0  ;;  %s894_s0 = inlined_call_operand.vmem [shape: f32[3], index: 0, kind: input, shape index: {}]   ;;  %s895_s1 = inlined_call_operand.vmem [shape: f32[8,128], index: 1, kind: input, shape index: {}]   ;;  %s896_s2 = inlined_call_operand.hbm [shape: f32[128,384], index: 2, kind: input, shape index: {}]   ;;  %s897_s3 = inlined_call_operand.hbm [shape: f32[384,256], index: 3, kind: input, shape index: {}]   ;;  %s898_s4 = inlined_call_operand.hbm [shape: f32[256,128], index: 4, kind: input, shape index: {}]   ;;  %s899_s5 = inlined_call_operand.vmem [shape: f32[8,128], index: 5, kind: output, shape index: {}]  }
   0x1   :  { %11 = vsyncpa [#allocation3], 0 }
   0x2   :  { %12 = vsyncpa [#allocation7], 0  ;;  %s815_s18 = smov [#allocation6]   ;;  %s19_s22 = sshll.u32 %s894_s0, 4  ;;  %s20_s22 = int_to_ptr.vmem [resolvable:$true] %s19_s22 }
   0x3   :  { %s42_s19 = sshll.u32 %s815_s18, 4  ;;  %s43_s19 = int_to_ptr.vmem [resolvable:$true] %s42_s19 }
   0x4   :  { %s745_s23 = scalar_lea.vmem %s43_s19, 12288  ;;  %p750_p1 = scmp.lt.s32.totalorder %s43_s19, %s43_s19 }
   0x5   :  { %p746_p0 = scmp.ne.s32.totalorder %s43_s19, %s745_s23  ;;  %p751_p2 = scmp.lt.s32.totalorder %s745_s23, %s745_s23 }
   0x7   :  { %p752_p3 = por %p751_p2, %p750_p1 }
   0x9   :  { %p753_p4 = pnand %p752_p3, %p746_p0 }
   0xb   :  { %756 = shalt.err (!%p753_p4)
}
   0xc   :  { %s816_s24 = smov 256   ;;  %s817_s25 = smov 16  }
   0xd   :  { %48 = dma.hbm_to_vmem [thread:$0]  %s897_s3, 12288, %s43_s19, [#allocation7], %s816_s24, %s816_s24, %s817_s25  }
   0xe   :  { %s757_s28 = scalar_lea.vmem %s20_s22, 16  ;;  %p762_p6 = scmp.lt.s32.totalorder %s20_s22, %s20_s22 }
   0xf   :  { %p758_p5 = scmp.ne.s32.totalorder %s20_s22, %s757_s28  ;;  %p763_p7 = scmp.lt.s32.totalorder %s757_s28, %s757_s28 }
  0x11   :  { %p764_p8 = por %p763_p7, %p762_p6 }
  0x13   :  { %p765_p9 = pnand %p764_p8, %p758_p5 }
  0x15   :  { %768 = shalt.err (!%p765_p9)
}
  0x16   :  { %s818_s0 = smov [#allocation2]   ;;  %s819_s29 = smov [#allocation5]  }
  0x17   :  { %22 = dma.vmem_to_smem %s20_s22, 16, %s818_s0, [#allocation4]  }
  0x18   :  { %s30_s30 = sshll.u32 %s819_s29, 4  ;;  %s31_s30 = int_to_ptr.vmem [resolvable:$true] %s30_s30 }
  0x19   :  { %s777_s6 = scalar_lea.vmem %s31_s30, 6144  ;;  %p782_p11 = scmp.lt.s32.totalorder %s31_s30, %s31_s30 }
  0x1a   :  { %p778_p10 = scmp.ne.s32.totalorder %s31_s30, %s777_s6  ;;  %p783_p12 = scmp.lt.s32.totalorder %s777_s6, %s777_s6 }
  0x1c   :  { %p784_p13 = por %p783_p12, %p782_p11 }
  0x1e   :  { %p785_p0 = pnand %p784_p13, %p778_p10 }
  0x20   :  { %788 = shalt.err (!%p785_p0)
}
  0x21   :  { %s820_s3 = smov 384   ;;  %s821_s7 = smov 24  }
  0x22   :  { %36 = dma.hbm_to_vmem [thread:$0]  %s896_s2, 6144, %s31_s30, [#allocation3], %s820_s3, %s820_s3, %s821_s7  }
  0x23   :  { %s822_s10 = smov [#allocation8]  }
  0x24   :  { %s54_s11 = sshll.u32 %s822_s10, 4  ;;  %s55_s11 = int_to_ptr.vmem [resolvable:$true] %s54_s11 }
  0x25   :  { %s797_s12 = scalar_lea.vmem %s55_s11, 4096  ;;  %p802_p2 = scmp.lt.s32.totalorder %s55_s11, %s55_s11 }
  0x26   :  { %p798_p1 = scmp.ne.s32.totalorder %s55_s11, %s797_s12  ;;  %p803_p3 = scmp.lt.s32.totalorder %s797_s12, %s797_s12 }
  0x28   :  { %p804_p4 = por %p803_p3, %p802_p2 }
  0x2a   :  { %p805_p5 = pnand %p804_p4, %p798_p1 }
  0x2c   :  { %808 = shalt.err (!%p805_p5)
}
  0x2d   :  { %s823_s13 = smov 128   ;;  %s824_s14 = smov 8  }
  0x2e   :  { %60 = dma.hbm_to_vmem [thread:$0]  %s898_s4, 4096, %s55_s11, [#allocation7], %s823_s13, %s823_s13, %s824_s14  }
  0x2f   :  { %809 = dma.done.wait [#allocation4], 16  }
  0x30   :  { %810 = vsyncadd [#allocation4], 4294967280 }
  0x31   :  { %811 = dma.done.wait [#allocation3], 6144  }
  0x32   :  { %812 = vsyncadd [#allocation3], 4294961152 }
  0x33   :  { %813 = dma.done.wait [#allocation7], 16384  }
  0x34   :  { %814 = vsyncadd [#allocation7], 4294950912 }
  0x35   :  { %73 = sfence }
  0x36   :  { %v124_v0 = vld [vmem:[#allocation5 + $0x170] sm:$0xff]  ;;  %v123_v1 = vld [vmem:[#allocation5 + $0x168] sm:$0xff]  ;;  %v125_v2 = vld [vmem:[#allocation5 + $0x178] sm:$0xff]  ;;  %v825_v3 = vmov 0.0   ;;  %vm826_vm0 = vmmov 0   ;;  %s636_s17 = sld [smem:[#allocation2 + $0x1]] }
  0x37   :  { %126 = vmatprep.subr.mxu0 %v124_v0  ;;  %690 = vmatprep.subr.mxu1 %v825_v3  ;;  %v121_v4 = vld [vmem:[#allocation5 + $0x158] sm:$0xff]  ;;  %v120_v5 = vld [vmem:[#allocation5 + $0x150] sm:$0xff]  ;;  %v122_v6 = vld [vmem:[#allocation5 + $0x160] sm:$0xff]  ;;  %s637_s18 = sld [smem:[#allocation2 + $0x2]] }
  0x38   :  { %127 = vmatpush1.msra.mxu0 %v123_v1  ;;  %691 = vmatpush3.msra.mxu1 %v125_v2  ;;  %v118_v7 = vld [vmem:[#allocation5 + $0x140] sm:$0xff]  ;;  %v117_v8 = vld [vmem:[#allocation5 + $0x138] sm:$0xff]  ;;  %v119_v9 = vld [vmem:[#allocation5 + $0x148] sm:$0xff] }
  0x39   :  { %128 = vmatprep.subr.mxu0 %v121_v4  ;;  %692 = vmatprep.subr.mxu1 %v825_v3  ;;  %v115_v10 = vld [vmem:[#allocation5 + $0x128] sm:$0xff]  ;;  %v114_v11 = vld [vmem:[#allocation5 + $0x120] sm:$0xff]  ;;  %v116_v12 = vld [vmem:[#allocation5 + $0x130] sm:$0xff] }
  0x3a   :  { %129 = vmatpush1.msra.mxu0 %v120_v5  ;;  %693 = vmatpush3.msra.mxu1 %v122_v6  ;;  %v112_v13 = vld [vmem:[#allocation5 + $0x110] sm:$0xff]  ;;  %v111_v14 = vld [vmem:[#allocation5 + $0x108] sm:$0xff]  ;;  %v113_v15 = vld [vmem:[#allocation5 + $0x118] sm:$0xff] }
  0x3b   :  { %130 = vmatprep.subr.mxu0 %v118_v7  ;;  %694 = vmatprep.subr.mxu1 %v825_v3  ;;  %v109_v16 = vld [vmem:[#allocation5 + $0xf8] sm:$0xff]  ;;  %v108_v17 = vld [vmem:[#allocation5 + $0xf0] sm:$0xff]  ;;  %v110_v18 = vld [vmem:[#allocation5 + $0x100] sm:$0xff] }
  0x3c   :  { %131 = vmatpush1.msra.mxu0 %v117_v8  ;;  %695 = vmatpush3.msra.mxu1 %v119_v9  ;;  %v106_v19 = vld [vmem:[#allocation5 + $0xe0] sm:$0xff]  ;;  %v105_v20 = vld [vmem:[#allocation5 + $0xd8] sm:$0xff]  ;;  %v107_v21 = vld [vmem:[#allocation5 + $0xe8] sm:$0xff] }
  0x3d   :  { %132 = vmatprep.subr.mxu0 %v115_v10  ;;  %696 = vmatprep.subr.mxu1 %v825_v3  ;;  %v103_v22 = vld [vmem:[#allocation5 + $0xc8] sm:$0xff]  ;;  %v102_v23 = vld [vmem:[#allocation5 + $0xc0] sm:$0xff]  ;;  %v104_v24 = vld [vmem:[#allocation5 + $0xd0] sm:$0xff] }
  0x3e   :  { %133 = vmatpush1.msra.mxu0 %v114_v11  ;;  %697 = vmatpush3.msra.mxu1 %v116_v12  ;;  %v100_v25 = vld [vmem:[#allocation5 + $0xb0] sm:$0xff]  ;;  %v99_v26 = vld [vmem:[#allocation5 + $0xa8] sm:$0xff]  ;;  %v101_v27 = vld [vmem:[#allocation5 + $0xb8] sm:$0xff] }
  0x3f   :  { %134 = vmatprep.subr.mxu0 %v112_v13  ;;  %698 = vmatprep.subr.mxu1 %v825_v3  ;;  %v97_v28 = vld [vmem:[#allocation5 + $0x98] sm:$0xff]  ;;  %v96_v29 = vld [vmem:[#allocation5 + $0x90] sm:$0xff]  ;;  %v98_v30 = vld [vmem:[#allocation5 + $0xa0] sm:$0xff] }
  0x40   :  { %135 = vmatpush1.msra.mxu0 %v111_v14  ;;  %699 = vmatpush3.msra.mxu1 %v113_v15  ;;  %v94_v31 = vld [vmem:[#allocation5 + $0x80] sm:$0xff]  ;;  %v93_v32 = vld [vmem:[#allocation5 + $0x78] sm:$0xff]  ;;  %v95_v33 = vld [vmem:[#allocation5 + $0x88] sm:$0xff] }
  0x41   :  { %136 = vmatprep.subr.mxu0 %v109_v16  ;;  %700 = vmatprep.subr.mxu1 %v825_v3  ;;  %v91_v34 = vld [vmem:[#allocation5 + $0x68] sm:$0xff]  ;;  %v90_v35 = vld [vmem:[#allocation5 + $0x60] sm:$0xff]  ;;  %v92_v36 = vld [vmem:[#allocation5 + $0x70] sm:$0xff] }
  0x42   :  { %137 = vmatpush1.msra.mxu0 %v108_v17  ;;  %701 = vmatpush3.msra.mxu1 %v110_v18  ;;  %v88_v37 = vld [vmem:[#allocation5 + $0x50] sm:$0xff]  ;;  %v87_v38 = vld [vmem:[#allocation5 + $0x48] sm:$0xff]  ;;  %v89_v39 = vld [vmem:[#allocation5 + $0x58] sm:$0xff] }
  0x43   :  { %138 = vmatprep.subr.mxu0 %v106_v19  ;;  %702 = vmatprep.subr.mxu1 %v825_v3  ;;  %v85_v40 = vld [vmem:[#allocation5 + $0x38] sm:$0xff]  ;;  %v84_v41 = vld [vmem:[#allocation5 + $0x30] sm:$0xff]  ;;  %v86_v42 = vld [vmem:[#allocation5 + $0x40] sm:$0xff] }
  0x44   :  { %139 = vmatpush1.msra.mxu0 %v105_v20  ;;  %703 = vmatpush3.msra.mxu1 %v107_v21  ;;  %v82_v43 = vld [vmem:[#allocation5 + $0x20] sm:$0xff]  ;;  %v81_v44 = vld [vmem:[#allocation5 + $0x18] sm:$0xff]  ;;  %v83_v45 = vld [vmem:[#allocation5 + $0x28] sm:$0xff] }
  0x45   :  { %140 = vmatprep.subr.mxu0 %v103_v22  ;;  %704 = vmatprep.subr.mxu1 %v825_v3  ;;  %v79_v46 = vld [vmem:[#allocation5 + $0x8] sm:$0xff]  ;;  %v78_v47 = vld [vmem:[#allocation5] sm:$0xff]  ;;  %v80_v48 = vld [vmem:[#allocation5 + $0x10] sm:$0xff] }
  0x46   :  { %141 = vmatpush1.msra.mxu0 %v102_v23  ;;  %705 = vmatpush3.msra.mxu1 %v104_v24  ;;  %v77_v49 = vld [vmem:[%s895_s1] sm:$0xff]  ;;  %v308_v50 = vld [vmem:[#allocation6 + $0xf8] sm:$0xff]  ;;  %v307_v52 = vld [vmem:[#allocation6 + $0xf0] sm:$0xff]  ;;  %s74_s1 = sld [smem:[#allocation2]] }
  0x47   :  { %142 = vmatprep.subr.mxu0 %v100_v25  ;;  %706 = vmatprep.subr.mxu1 %v825_v3  ;;  %v372_v51 = vld [vmem:[#allocation6 + $0x2f8] sm:$0xff]  ;;  %v371_v53 = vld [vmem:[#allocation6 + $0x2f0] sm:$0xff]  ;;  %v306_v54 = vld [vmem:[#allocation6 + $0xe8] sm:$0xff] }
  0x48   :  { %143 = vmatpush1.msra.mxu0 %v99_v26  ;;  %707 = vmatpush3.msra.mxu1 %v101_v27  ;;  %v370_v55 = vld [vmem:[#allocation6 + $0x2e8] sm:$0xff]  ;;  %v305_v56 = vld [vmem:[#allocation6 + $0xe0] sm:$0xff]  ;;  %v304_v58 = vld [vmem:[#allocation6 + $0xd8] sm:$0xff] }
  0x49   :  { %144 = vmatprep.subr.mxu0 %v97_v28  ;;  %708 = vmatprep.subr.mxu1 %v825_v3  ;;  %v369_v57 = vld [vmem:[#allocation6 + $0x2e0] sm:$0xff]  ;;  %v368_v59 = vld [vmem:[#allocation6 + $0x2d8] sm:$0xff]  ;;  %v303_v60 = vld [vmem:[#allocation6 + $0xd0] sm:$0xff] }
  0x4a   :  { %145 = vmatpush1.msra.mxu0 %v96_v29  ;;  %709 = vmatpush3.msra.mxu1 %v98_v30  ;;  %v367_v61 = vld [vmem:[#allocation6 + $0x2d0] sm:$0xff]  ;;  %v302_v62 = vld [vmem:[#allocation6 + $0xc8] sm:$0xff]  ;;  %v301_v0 = vld [vmem:[#allocation6 + $0xc0] sm:$0xff] }
  0x4b   :  { %146 = vmatprep.subr.mxu0 %v94_v31  ;;  %710 = vmatprep.subr.mxu1 %v825_v3  ;;  %v366_v63 = vld [vmem:[#allocation6 + $0x2c8] sm:$0xff]  ;;  %v365_v1 = vld [vmem:[#allocation6 + $0x2c0] sm:$0xff]  ;;  %v300_v2 = vld [vmem:[#allocation6 + $0xb8] sm:$0xff] }
  0x4c   :  { %147 = vmatpush1.msra.mxu0 %v93_v32  ;;  %711 = vmatpush3.msra.mxu1 %v95_v33  ;;  %v364_v4 = vld [vmem:[#allocation6 + $0x2b8] sm:$0xff]  ;;  %v299_v5 = vld [vmem:[#allocation6 + $0xb0] sm:$0xff]  ;;  %v298_v7 = vld [vmem:[#allocation6 + $0xa8] sm:$0xff] }
  0x4d   :  { %148 = vmatprep.subr.mxu0 %v91_v34  ;;  %712 = vmatprep.subr.mxu1 %v825_v3  ;;  %v363_v6 = vld [vmem:[#allocation6 + $0x2b0] sm:$0xff]  ;;  %v362_v8 = vld [vmem:[#allocation6 + $0x2a8] sm:$0xff]  ;;  %v297_v9 = vld [vmem:[#allocation6 + $0xa0] sm:$0xff] }
  0x4e   :  { %149 = vmatpush1.msra.mxu0 %v90_v35  ;;  %713 = vmatpush3.msra.mxu1 %v92_v36  ;;  %v361_v10 = vld [vmem:[#allocation6 + $0x2a0] sm:$0xff]  ;;  %v296_v11 = vld [vmem:[#allocation6 + $0x98] sm:$0xff]  ;;  %v295_v13 = vld [vmem:[#allocation6 + $0x90] sm:$0xff] }
  0x4f   :  { %150 = vmatprep.subr.mxu0 %v88_v37  ;;  %714 = vmatprep.subr.mxu1 %v825_v3  ;;  %v360_v12 = vld [vmem:[#allocation6 + $0x298] sm:$0xff]  ;;  %v359_v14 = vld [vmem:[#allocation6 + $0x290] sm:$0xff]  ;;  %v294_v15 = vld [vmem:[#allocation6 + $0x88] sm:$0xff] }
  0x50   :  { %151 = vmatpush1.msra.mxu0 %v87_v38  ;;  %715 = vmatpush3.msra.mxu1 %v89_v39  ;;  %v358_v16 = vld [vmem:[#allocation6 + $0x288] sm:$0xff]  ;;  %v293_v17 = vld [vmem:[#allocation6 + $0x80] sm:$0xff]  ;;  %v292_v19 = vld [vmem:[#allocation6 + $0x78] sm:$0xff] }
  0x51   :  { %152 = vmatprep.subr.mxu0 %v85_v40  ;;  %716 = vmatprep.subr.mxu1 %v825_v3  ;;  %v357_v18 = vld [vmem:[#allocation6 + $0x280] sm:$0xff]  ;;  %v356_v20 = vld [vmem:[#allocation6 + $0x278] sm:$0xff]  ;;  %v291_v21 = vld [vmem:[#allocation6 + $0x70] sm:$0xff] }
  0x52   :  { %153 = vmatpush1.msra.mxu0 %v84_v41  ;;  %717 = vmatpush3.msra.mxu1 %v86_v42  ;;  %v355_v22 = vld [vmem:[#allocation6 + $0x270] sm:$0xff]  ;;  %v290_v23 = vld [vmem:[#allocation6 + $0x68] sm:$0xff]  ;;  %v289_v25 = vld [vmem:[#allocation6 + $0x60] sm:$0xff] }
  0x53   :  { %154 = vmatprep.subr.mxu0 %v82_v43  ;;  %718 = vmatprep.subr.mxu1 %v825_v3  ;;  %v354_v24 = vld [vmem:[#allocation6 + $0x268] sm:$0xff]  ;;  %v353_v26 = vld [vmem:[#allocation6 + $0x260] sm:$0xff]  ;;  %v288_v27 = vld [vmem:[#allocation6 + $0x58] sm:$0xff] }
  0x54   :  { %155 = vmatpush1.msra.mxu0 %v81_v44  ;;  %719 = vmatpush3.msra.mxu1 %v83_v45  ;;  %v352_v28 = vld [vmem:[#allocation6 + $0x258] sm:$0xff]  ;;  %v287_v29 = vld [vmem:[#allocation6 + $0x50] sm:$0xff]  ;;  %v286_v31 = vld [vmem:[#allocation6 + $0x48] sm:$0xff] }
  0x55   :  { %156 = vmatprep.subr.mxu0 %v79_v46  ;;  %720 = vmatprep.subr.mxu1 %v825_v3  ;;  %v351_v30 = vld [vmem:[#allocation6 + $0x250] sm:$0xff]  ;;  %v350_v32 = vld [vmem:[#allocation6 + $0x248] sm:$0xff]  ;;  %v285_v33 = vld [vmem:[#allocation6 + $0x40] sm:$0xff] }
  0x56   :  { %157 = vmatpush1.msra.mxu0 %v78_v47  ;;  %190 = vmatprep.mubr.f32.mxu0 %v825_v3  ;;  %v349_v34 = vld [vmem:[#allocation6 + $0x240] sm:$0xff]  ;;  %v284_v35 = vld [vmem:[#allocation6 + $0x38] sm:$0xff]  ;;  %v283_v37 = vld [vmem:[#allocation6 + $0x30] sm:$0xff] }
  0x57   :  { %721 = vmatpush3.msra.mxu1 %v80_v48  ;;  %722 = vmatprep.mubr.msk.f32.mxu1 %vm826_vm0, %v825_v3  ;;  %v348_v36 = vld [vmem:[#allocation6 + $0x238] sm:$0xff]  ;;  %v347_v38 = vld [vmem:[#allocation6 + $0x230] sm:$0xff]  ;;  %v282_v39 = vld [vmem:[#allocation6 + $0x28] sm:$0xff] }
  0x58   :  { %191 = vmatmul.mubr.f32.vlgmr.msra.gmra.mxu0 %v77_v49  ;;  %723 = vmatmul.mubr.f32.vlgmr.msra.gmra.mxu1 %v77_v49  ;;  %v346_v40 = vld [vmem:[#allocation6 + $0x228] sm:$0xff]  ;;  %v281_v41 = vld [vmem:[#allocation6 + $0x20] sm:$0xff]  ;;  %v280_v43 = vld [vmem:[#allocation6 + $0x18] sm:$0xff] }
  0x59   :  { %373 = vmatprep.subr.mxu0 %v308_v50  ;;  %444 = vmatprep.subr.mxu1 %v372_v51  ;;  %v345_v42 = vld [vmem:[#allocation6 + $0x220] sm:$0xff]  ;;  %v279_v44 = vld [vmem:[#allocation6 + $0x10] sm:$0xff]  ;;  %v278_v45 = vld [vmem:[#allocation6 + $0x8] sm:$0xff] }
  0x5a   :  { %374 = vmatpush1.msra.mxu0 %v307_v52  ;;  %445 = vmatpush1.msra.mxu1 %v371_v53  ;;  %v277_v46 = vld [vmem:[#allocation6] sm:$0xff]  ;;  %v340_v47 = vld [vmem:[#allocation6 + $0x1f8] sm:$0xff]  ;;  %v339_v48 = vld [vmem:[#allocation6 + $0x1f0] sm:$0xff] }
  0x5b   :  { %375 = vmatprep.subr.mxu0 %v306_v54  ;;  %446 = vmatprep.subr.mxu1 %v370_v55  ;;  %v338_v49 = vld [vmem:[#allocation6 + $0x1e8] sm:$0xff]  ;;  %v337_v50 = vld [vmem:[#allocation6 + $0x1e0] sm:$0xff]  ;;  %v336_v51 = vld [vmem:[#allocation6 + $0x1d8] sm:$0xff] }
  0x5c   :  { %376 = vmatpush1.msra.mxu0 %v305_v56  ;;  %447 = vmatpush1.msra.mxu1 %v369_v57  ;;  %v335_v52 = vld [vmem:[#allocation6 + $0x1d0] sm:$0xff]  ;;  %v334_v53 = vld [vmem:[#allocation6 + $0x1c8] sm:$0xff]  ;;  %v333_v54 = vld [vmem:[#allocation6 + $0x1c0] sm:$0xff] }
  0x5d   :  { %377 = vmatprep.subr.mxu0 %v304_v58  ;;  %448 = vmatprep.subr.mxu1 %v368_v59  ;;  %v332_v55 = vld [vmem:[#allocation6 + $0x1b8] sm:$0xff]  ;;  %v330_v56 = vld [vmem:[#allocation6 + $0x1a8] sm:$0xff]  ;;  %v329_v57 = vld [vmem:[#allocation6 + $0x1a0] sm:$0xff] }
  0x5e   :  { %378 = vmatpush1.msra.mxu0 %v303_v60  ;;  %449 = vmatpush1.msra.mxu1 %v367_v61  ;;  %v328_v58 = vld [vmem:[#allocation6 + $0x198] sm:$0xff]  ;;  %v327_v59 = vld [vmem:[#allocation6 + $0x190] sm:$0xff]  ;;  %v326_v60 = vld [vmem:[#allocation6 + $0x188] sm:$0xff] }
  0x5f   :  { %379 = vmatprep.subr.mxu0 %v302_v62  ;;  %450 = vmatprep.subr.mxu1 %v366_v63  ;;  %v325_v61 = vld [vmem:[#allocation6 + $0x180] sm:$0xff]  ;;  %v324_v62 = vld [vmem:[#allocation6 + $0x178] sm:$0xff]  ;;  %v323_v63 = vld [vmem:[#allocation6 + $0x170] sm:$0xff] }
  0x60   :  { %380 = vmatpush1.msra.mxu0 %v301_v0  ;;  %451 = vmatpush1.msra.mxu1 %v365_v1  ;;  %v322_v0 = vld [vmem:[#allocation6 + $0x168] sm:$0xff]  ;;  %v321_v1 = vld [vmem:[#allocation6 + $0x160] sm:$0xff] }
  0x61   :  { %381 = vmatprep.subr.mxu0 %v300_v2  ;;  %452 = vmatprep.subr.mxu1 %v364_v4  ;;  %v320_v2 = vld [vmem:[#allocation6 + $0x158] sm:$0xff]  ;;  %v319_v4 = vld [vmem:[#allocation6 + $0x150] sm:$0xff] }
  0x62   :  { %382 = vmatpush1.msra.mxu0 %v299_v5  ;;  %453 = vmatpush1.msra.mxu1 %v363_v6  ;;  %v318_v5 = vld [vmem:[#allocation6 + $0x148] sm:$0xff]  ;;  %v317_v6 = vld [vmem:[#allocation6 + $0x140] sm:$0xff] }
  0x63   :  { %383 = vmatprep.subr.mxu0 %v298_v7  ;;  %454 = vmatprep.subr.mxu1 %v362_v8  ;;  %v316_v7 = vld [vmem:[#allocation6 + $0x138] sm:$0xff]  ;;  %v315_v8 = vld [vmem:[#allocation6 + $0x130] sm:$0xff] }
  0x64   :  { %384 = vmatpush1.msra.mxu0 %v297_v9  ;;  %455 = vmatpush1.msra.mxu1 %v361_v10  ;;  %v344_v9 = vld [vmem:[#allocation6 + $0x218] sm:$0xff]  ;;  %v314_v10 = vld [vmem:[#allocation6 + $0x128] sm:$0xff] }
  0x65   :  { %385 = vmatprep.subr.mxu0 %v296_v11  ;;  %456 = vmatprep.subr.mxu1 %v360_v12  ;;  %v343_v11 = vld [vmem:[#allocation6 + $0x210] sm:$0xff]  ;;  %v313_v12 = vld [vmem:[#allocation6 + $0x120] sm:$0xff] }
  0x66   :  { %386 = vmatpush1.msra.mxu0 %v295_v13  ;;  %457 = vmatpush1.msra.mxu1 %v359_v14  ;;  %v342_v13 = vld [vmem:[#allocation6 + $0x208] sm:$0xff]  ;;  %v312_v14 = vld [vmem:[#allocation6 + $0x118] sm:$0xff] }
  0x67   :  { %387 = vmatprep.subr.mxu0 %v294_v15  ;;  %458 = vmatprep.subr.mxu1 %v358_v16  ;;  %v341_v15 = vld [vmem:[#allocation6 + $0x200] sm:$0xff]  ;;  %v311_v16 = vld [vmem:[#allocation6 + $0x110] sm:$0xff] }
  0x68   :  { %388 = vmatpush1.msra.mxu0 %v293_v17  ;;  %459 = vmatpush1.msra.mxu1 %v357_v18  ;;  %v310_v17 = vld [vmem:[#allocation6 + $0x108] sm:$0xff]  ;;  %v309_v18 = vld [vmem:[#allocation6 + $0x100] sm:$0xff] }
  0x69   :  { %389 = vmatprep.subr.mxu0 %v292_v19  ;;  %460 = vmatprep.subr.mxu1 %v356_v20  ;;  %v553_v19 = vld [vmem:[#allocation8 + $0xf8] sm:$0xff]  ;;  %v270_v20 = vstv %s74_s1 }
  0x6a   :  { %390 = vmatpush1.msra.mxu0 %v291_v21  ;;  %461 = vmatpush1.msra.mxu1 %v355_v22 }
  0x6b   :  { %391 = vmatprep.subr.mxu0 %v290_v23  ;;  %462 = vmatprep.subr.mxu1 %v354_v24 }
  0x6c   :  { %392 = vmatpush1.msra.mxu0 %v289_v25  ;;  %463 = vmatpush1.msra.mxu1 %v353_v26 }
  0x6d   :  { %393 = vmatprep.subr.mxu0 %v288_v27  ;;  %464 = vmatprep.subr.mxu1 %v352_v28  ;;  %v537_v27 = vld [vmem:[#allocation8 + $0x78] sm:$0xff] }
  0x6e   :  { %394 = vmatpush1.msra.mxu0 %v287_v29  ;;  %465 = vmatpush1.msra.mxu1 %v351_v30  ;;  %v552_v30 = vld [vmem:[#allocation8 + $0xf0] sm:$0xff] }
  0x6f   :  { %395 = vmatprep.subr.mxu0 %v286_v31  ;;  %466 = vmatprep.subr.mxu1 %v350_v32  ;;  %v536_v31 = vld [vmem:[#allocation8 + $0x70] sm:$0xff] }
  0x70   :  { %396 = vmatpush1.msra.mxu0 %v285_v33  ;;  %467 = vmatpush1.msra.mxu1 %v349_v34  ;;  %v551_v33 = vld [vmem:[#allocation8 + $0xe8] sm:$0xff] }
  0x71   :  { %397 = vmatprep.subr.mxu0 %v284_v35  ;;  %468 = vmatprep.subr.mxu1 %v348_v36  ;;  %v535_v35 = vld [vmem:[#allocation8 + $0x68] sm:$0xff]  ;;  %v550_v36 = vld [vmem:[#allocation8 + $0xe0] sm:$0xff] }
  0x72   :  { %398 = vmatpush1.msra.mxu0 %v283_v37  ;;  %469 = vmatpush1.msra.mxu1 %v347_v38  ;;  %v534_v37 = vld [vmem:[#allocation8 + $0x60] sm:$0xff]  ;;  %v549_v38 = vld [vmem:[#allocation8 + $0xd8] sm:$0xff] }
  0x73   :  { %399 = vmatprep.subr.mxu0 %v282_v39  ;;  %470 = vmatprep.subr.mxu1 %v346_v40  ;;  %v533_v39 = vld [vmem:[#allocation8 + $0x58] sm:$0xff]  ;;  %v548_v40 = vld [vmem:[#allocation8 + $0xd0] sm:$0xff] }
  0x74   :  { %400 = vmatpush1.msra.mxu0 %v281_v41  ;;  %471 = vmatpush1.msra.mxu1 %v345_v42  ;;  %v532_v41 = vld [vmem:[#allocation8 + $0x50] sm:$0xff]  ;;  %v547_v42 = vld [vmem:[#allocation8 + $0xc8] sm:$0xff] }
  0x75   :  { %401 = vmatprep.subr.mxu0 %v280_v43  ;;  %508 = vmatprep.mubr.f32.mxu1 %v825_v3  ;;  %v331_v3 = vld [vmem:[#allocation6 + $0x1b0] sm:$0xff]  ;;  %v531_v43 = vld [vmem:[#allocation8 + $0x48] sm:$0xff] }
  0x76   :  { %402 = vmatpush1.msra.mxu0 %v279_v44  ;;  %472 = vmatprep.subr.mxu1 %v344_v9  ;;  %v546_v44 = vld [vmem:[#allocation8 + $0xc0] sm:$0xff] }
  0x77   :  { %403 = vmatprep.subr.mxu0 %v278_v45  ;;  %473 = vmatpush1.msra.mxu1 %v343_v11  ;;  %v530_v45 = vld [vmem:[#allocation8 + $0x40] sm:$0xff]  ;;  %v625_v11 = vstv %s637_s18 }
  0x78   :  { %404 = vmatpush1.msra.mxu0 %v277_v46  ;;  %474 = vmatprep.subr.mxu1 %v342_v13  ;;  %v545_v46 = vld [vmem:[#allocation8 + $0xb8] sm:$0xff] }
  0x79   :  { %405 = vmatprep.subr.mxu0 %v340_v47  ;;  %475 = vmatpush1.msra.mxu1 %v341_v15  ;;  %v529_v47 = vld [vmem:[#allocation8 + $0x38] sm:$0xff] }
  0x7a   :  { %406 = vmatpush2.msra.mxu0 %v339_v48  ;;  %655 = vmatprep.subr.mxu1 %v553_v19  ;;  %v544_v48 = vld [vmem:[#allocation8 + $0xb0] sm:$0xff] }
  0x7b   :  { %407 = vmatprep.subr.mxu0 %v338_v49  ;;  %v528_v49 = vld [vmem:[#allocation8 + $0x30] sm:$0xff] }
  0x7c   :  { %408 = vmatpush2.msra.mxu0 %v337_v50  ;;  %v543_v50 = vld [vmem:[#allocation8 + $0xa8] sm:$0xff] }
  0x7d   :  { %409 = vmatprep.subr.mxu0 %v336_v51  ;;  %v527_v51 = vld [vmem:[#allocation8 + $0x28] sm:$0xff] }
  0x7e   :  { %410 = vmatpush2.msra.mxu0 %v335_v52  ;;  %v542_v52 = vld [vmem:[#allocation8 + $0xa0] sm:$0xff] }
  0x7f   :  { %411 = vmatprep.subr.mxu0 %v334_v53  ;;  %v526_v53 = vld [vmem:[#allocation8 + $0x20] sm:$0xff] }
  0x80   :  { %412 = vmatpush2.msra.mxu0 %v333_v54  ;;  %v541_v54 = vld [vmem:[#allocation8 + $0x98] sm:$0xff] }
  0x81   :  { %413 = vmatprep.subr.mxu0 %v332_v55  ;;  %v525_v55 = vld [vmem:[#allocation8 + $0x18] sm:$0xff] }
  0x82   :  { %414 = vmatpush2.msra.mxu0 %v331_v3  ;;  %v540_v3 = vld [vmem:[#allocation8 + $0x90] sm:$0xff] }
  0x83   :  { %415 = vmatprep.subr.mxu0 %v330_v56  ;;  %v524_v56 = vld [vmem:[#allocation8 + $0x10] sm:$0xff] }
  0x84   :  { %416 = vmatpush2.msra.mxu0 %v329_v57  ;;  %v539_v57 = vld [vmem:[#allocation8 + $0x88] sm:$0xff] }
  0x85   :  { %417 = vmatprep.subr.mxu0 %v328_v58  ;;  %v523_v58 = vld [vmem:[#allocation8 + $0x8] sm:$0xff] }
  0x86   :  { %418 = vmatpush2.msra.mxu0 %v327_v59  ;;  %v538_v59 = vld [vmem:[#allocation8 + $0x80] sm:$0xff] }
  0x87   :  { %419 = vmatprep.subr.mxu0 %v326_v60  ;;  %v522_v60 = vld [vmem:[#allocation8] sm:$0xff] }
  0x88   :  { %420 = vmatpush2.msra.mxu0 %v325_v61 }
  0x89   :  { %421 = vmatprep.subr.mxu0 %v324_v62 }
  0x8a   :  { %422 = vmatpush2.msra.mxu0 %v323_v63 }
  0x8b   :  { %423 = vmatprep.subr.mxu0 %v322_v0  ;;  %v517_v0 = vstv %s636_s17 }
  0x8c   :  { %424 = vmatpush2.msra.mxu0 %v321_v1 }
  0x8d   :  { %425 = vmatprep.subr.mxu0 %v320_v2 }
  0x8e   :  { %426 = vmatpush2.msra.mxu0 %v319_v4 }
  0x8f   :  { %427 = vmatprep.subr.mxu0 %v318_v5 }
  0x90   :  { %428 = vmatpush2.msra.mxu0 %v317_v6 }
  0x91   :  { %429 = vmatprep.subr.mxu0 %v316_v7 }
  0x92   :  { %430 = vmatpush2.msra.mxu0 %v315_v8 }
  0x93   :  { %431 = vmatprep.subr.mxu0 %v314_v10 }
  0x94   :  { %432 = vmatpush2.msra.mxu0 %v313_v12 }
  0x95   :  { %433 = vmatprep.subr.mxu0 %v312_v14 }
  0x96   :  { %434 = vmatpush2.msra.mxu0 %v311_v16 }
  0x97   :  { %435 = vmatprep.subr.mxu0 %v310_v17 }
  0x98   :  { %436 = vmatpush2.msra.mxu0 %v309_v18 }
 0x118   :  { %v192_v21 = vpop.f32.mrf.mxu0  ;;  %v263_v22 = vpop.f32.mrf.mxu1 }
 0x119   :  { %vm269_vm1 = vcmp.ge.f32.partialorder %v263_v22, 0.0  ;;  %v273_v23 = vmul.f32 %v270_v20, %v263_v22  ;;  %v271_v24 = vmul.f32 %v270_v20, %v192_v21  ;;  %vm267_vm2 = vcmp.ge.f32.partialorder %v192_v21, 0.0 }
 0x11a   :  { %v194_v25 = vpop.f32.mrf.mxu0  ;;  %v724_v26 = vpop.f32.mrf.mxu1 }
 0x11b   :  { %vm268_vm3 = vcmp.ge.f32.partialorder %v194_v25, 0.0  ;;  %v272_v28 = vmul.f32 %v270_v20, %v194_v25  ;;  %v276_v29 = vsel %vm269_vm1, %v263_v22, %v273_v23  ;;  %v274_v34 = vsel %vm267_vm2, %v192_v21, %v271_v24 }
 0x11c   :  { %509 = vmatmul.mubr.f32.vlgmr.msra.gmra.mxu1 %v276_v29 }
 0x11d   :  { %v275_v32 = vsel %vm268_vm3, %v194_v25, %v272_v28  ;;  %656 = vmatpush3.msra.mxu1 %v537_v27 }
 0x11e   :  { %437 = vmatprep.mubr.f32.mxu0 %v275_v32  ;;  %657 = vmatprep.subr.mxu1 %v552_v30 }
 0x11f   :  { %438 = vmatmul.mubr.f32.vlgmr.msra.gmra.mxu0 %v274_v34  ;;  %658 = vmatpush3.msra.mxu1 %v536_v31 }
 0x120   :  { %659 = vmatprep.subr.mxu1 %v551_v33 }
 0x121   :  { %660 = vmatpush3.msra.mxu1 %v535_v35 }
 0x122   :  { %661 = vmatprep.subr.mxu1 %v550_v36 }
 0x123   :  { %662 = vmatpush3.msra.mxu1 %v534_v37 }
 0x124   :  { %663 = vmatprep.subr.mxu1 %v549_v38 }
 0x125   :  { %664 = vmatpush3.msra.mxu1 %v533_v39 }
 0x126   :  { %665 = vmatprep.subr.mxu1 %v548_v40 }
 0x127   :  { %666 = vmatpush3.msra.mxu1 %v532_v41 }
 0x128   :  { %667 = vmatprep.subr.mxu1 %v547_v42 }
 0x129   :  { %668 = vmatpush3.msra.mxu1 %v531_v43 }
 0x12a   :  { %669 = vmatprep.subr.mxu1 %v546_v44 }
 0x12b   :  { %670 = vmatpush3.msra.mxu1 %v530_v45 }
 0x12c   :  { %671 = vmatprep.subr.mxu1 %v545_v46 }
 0x12d   :  { %672 = vmatpush3.msra.mxu1 %v529_v47 }
 0x12e   :  { %673 = vmatprep.subr.mxu1 %v544_v48 }
 0x12f   :  { %674 = vmatpush3.msra.mxu1 %v528_v49 }
 0x130   :  { %675 = vmatprep.subr.mxu1 %v543_v50 }
 0x131   :  { %676 = vmatpush3.msra.mxu1 %v527_v51 }
 0x132   :  { %677 = vmatprep.subr.mxu1 %v542_v52 }
 0x133   :  { %678 = vmatpush3.msra.mxu1 %v526_v53 }
 0x134   :  { %679 = vmatprep.subr.mxu1 %v541_v54 }
 0x135   :  { %680 = vmatpush3.msra.mxu1 %v525_v55 }
 0x136   :  { %681 = vmatprep.subr.mxu1 %v540_v3 }
 0x137   :  { %682 = vmatpush3.msra.mxu1 %v524_v56 }
 0x138   :  { %683 = vmatprep.subr.mxu1 %v539_v57 }
 0x139   :  { %684 = vmatpush3.msra.mxu1 %v523_v58 }
 0x13a   :  { %685 = vmatprep.subr.mxu1 %v538_v59 }
 0x13b   :  { %686 = vmatpush3.msra.mxu1 %v522_v60 }
 0x1dc   :  { %v510_v61 = vpop.f32.mrf.mxu1 }
 0x1de   :  { %v512_v1 = vpop.f32.mrf.mxu1 }
 0x1df   :  { %v439_v62 = vpop.f32.mrf.mxu0 }
 0x1e0   :  { %v511_v63 = vadd.f32 %v510_v61, %v439_v62 }
 0x1e1   :  { %v441_v2 = vpop.f32.mrf.mxu0 }
 0x1e2   :  { %v513_v4 = vadd.f32 %v512_v1, %v441_v2  ;;  %v518_v5 = vmul.f32 %v517_v0, %v511_v63  ;;  %vm515_vm4 = vcmp.ge.f32.partialorder %v511_v63, 0.0 }
 0x1e4   :  { %v519_v6 = vmul.f32 %v517_v0, %v513_v4  ;;  %vm516_vm5 = vcmp.ge.f32.partialorder %v513_v4, 0.0  ;;  %v520_v8 = vsel %vm515_vm4, %v511_v63, %v518_v5 }
 0x1e6   :  { %v521_v7 = vsel %vm516_vm5, %v513_v4, %v519_v6 }
 0x1e7   :  { %618 = vmatprep.mubr.f32.mxu1 %v521_v7 }
 0x1e8   :  { %619 = vmatmul.mubr.f32.vlgmr.msra.gmra.mxu1 %v520_v8 }
 0x2a8   :  { %v687_v9 = vpop.f32.mrf.mxu1 }
 0x2aa   :  { %v688_v10 = vpop.f32.mrf.mxu1 }
 0x2ab   :  { %v689_v12 = vadd.f32 %v688_v10, %v687_v9 }
 0x2ad   :  { %vm624_vm6 = vcmp.ge.f32.partialorder %v689_v12, 0.0  ;;  %v626_v13 = vmul.f32 %v689_v12, %v625_v11 }
 0x2af   :  { %v627_v14 = vsel %vm624_vm6, %v689_v12, %v626_v13 }
 0x2b0   :  { %628 = vst [vmem:[%s899_s5] sm:$0xff] %v627_v14 }
 0x2b1   :  { %633 = vsyncpa [#allocation3], 1 }
 0x2b2   :  { %634 = vsyncpa [#allocation7], 1 }
 0x2b3   :  { %635 = vsyncpa [#allocation4], 1 }

</bundles_post_ra>
